<compile_context>
chip_gen: v6e
topology: v6e:2x2x1
jax: 0.10.0
libtpu: 0.0.40
codegen_flags: <defaults>
</compile_context>

<pallas_src>
import jax
import jax.numpy as jnp
from jax.experimental import pallas as pl
from jax.experimental.pallas import tpu as pltpu


def stylein_kernel(x_ref, s_ref, m_ref, o_ref):
    # x_ref: (TR, HW)   s_ref / m_ref: (TR, 1)   o_ref: (TR, HW)
    hw = x_ref.shape[-1]

    # ---- stats pass (subtract-mean formulation; avoids E[x^2]-E[x]^2 cancellation)
    xf = x_ref[...].astype(jnp.float32)
    mean = jnp.mean(xf, axis=-1, keepdims=True)                    # (TR, 1)
    d = xf - mean
    # torch.var_mean default: unbiased variance (divide by N-1).
    # NOTE: matches torch exactly, including NaN when HW == 1 (0/0).
    var = jnp.sum(d * d, axis=-1, keepdims=True) / (hw - 1)        # (TR, 1)
    inv = jax.lax.rsqrt(var + 1e-6)                                # (TR, 1)

    # ---- fold affine into per-row scalars: out = x * a + b
    a = s_ref[...].astype(jnp.float32) * inv                       # (TR, 1)
    b = m_ref[...].astype(jnp.float32) - mean * a                  # (TR, 1)

    # ---- apply pass: re-read x_ref so only one f32 tile needs to be live,
    #      and only 2 VPU ops/element (mul, add) instead of 4.
    o_ref[...] = (x_ref[...].astype(jnp.float32) * a + b).astype(o_ref.dtype)


def _pick_row_tile(n_rows, hw, itemsize, max_block_bytes):
    """Largest multiple-of-8 row count that divides n_rows and keeps the
    (rows, hw) block under max_block_bytes per buffer."""
    if n_rows % 8 != 0 or n_rows < 8:
        # Full-extent block on the row axis is always allowed.
        return n_rows
    cap_rows = max(8, (max_block_bytes // max(1, hw * itemsize)) // 8 * 8)
    tr = min(n_rows, cap_rows)
    while n_rows % tr != 0:
        tr -= 8
    return tr


def style_in(x, y, sigma, mu, *, max_block_bytes=2 << 20):
    """x: [B, C, H, W], y: [B] int32 style ids, sigma/mu: [max_styles, C]."""
    B, C, H, W = x.shape
    HW = H * W
    R = B * C
    itemsize = jnp.dtype(x.dtype).itemsize

    # 2D row-major view: each row is one (b, c) instance-norm group.
    x2 = x.reshape(R, HW)
    # Gather per-batch style params in JAX glue; expand to per-row (B*C, 1).
    s_y = sigma[y].reshape(R, 1).astype(x.dtype)
    m_y = mu[y].reshape(R, 1).astype(x.dtype)

    tr = _pick_row_tile(R, HW, itemsize, max_block_bytes)
    grid = (pl.cdiv(R, tr),)   # tr divides R by construction (or tr == R)

    out2 = pl.pallas_call(
        stylein_kernel,
        out_shape=jax.ShapeDtypeStruct((R, HW), x.dtype),
        grid=grid,
        in_specs=[
            pl.BlockSpec((tr, HW), lambda i: (i, 0)),
            pl.BlockSpec((tr, 1), lambda i: (i, 0)),
            pl.BlockSpec((tr, 1), lambda i: (i, 0)),
        ],
        out_specs=pl.BlockSpec((tr, HW), lambda i: (i, 0)),
        compiler_params=pltpu.CompilerParams(
            dimension_semantics=("parallel",)),
        cost_estimate=pl.CostEstimate(
            flops=7 * R * HW,
            transcendentals=R,
            bytes_accessed=(2 * R * HW + 4 * R) * itemsize),
    )(x2, s_y, m_y)
    return out2.reshape(B, C, H, W)


def style_in_reference(x, y, sigma, mu):
    mean = jnp.mean(x, axis=(2, 3), keepdims=True)
    var = jnp.var(x, axis=(2, 3), keepdims=True, ddof=1)   # unbiased, like torch
    n = (x - mean) * jax.lax.rsqrt(var + 1e-6)
    return n * sigma[y][:, :, None, None] + mu[y][:, :, None, None]


if __name__ == "__main__":
    B, C, H, W = 2, 4, 16, 16
    max_styles = 8

    key = jax.random.PRNGKey(0)
    kx, ks, km = jax.random.split(key, 3)

    x = jax.random.normal(kx, (B, C, H, W), dtype=jnp.float32)
    # Module __init__ zero-inits mu/sigma of shape [max_styles, channels];
    # use deterministic non-zero values here so the affine path is exercised.
    sigma = jax.random.normal(ks, (max_styles, C), dtype=jnp.float32)
    mu = jax.random.normal(km, (max_styles, C), dtype=jnp.float32)
    y = jnp.array([1, 3], dtype=jnp.int32)

    out = style_in(x, y, sigma, mu)
    out = jax.block_until_ready(out)

    ref = style_in_reference(x, y, sigma, mu)
    assert out.shape == (B, C, H, W)
    assert jnp.allclose(out, ref, atol=1e-4, rtol=1e-4)

    print("KERNEL_OK")
</pallas_src>

<mosaic_0001>
module attributes {stable_mosaic.version = 11 : i64} {
  func.func @stylein_kernel(%arg0: i32, %arg1: memref<8x256xf32, #tpu.memory_space<vmem>>, %arg2: memref<8x1xf32, #tpu.memory_space<vmem>>, %arg3: memref<8x1xf32, #tpu.memory_space<vmem>>, %arg4: memref<8x256xf32, #tpu.memory_space<vmem>>) attributes {dimension_semantics = [#tpu.dimension_semantics<parallel>], iteration_bounds = array<i64: 1>, scalar_prefetch = 0 : i64, scratch_operands = 0 : i64, tpu.core_type = #tpu.core_type<tc>, window_params = [{transform_indices = @transform_0, window_bounds = array<i64: 8, 256>}, {transform_indices = @transform_1, window_bounds = array<i64: 8, 1>}, {transform_indices = @transform_2, window_bounds = array<i64: 8, 1>}, {transform_indices = @transform_3, window_bounds = array<i64: 8, 256>}]} {
    %c0 = arith.constant 0 : index
    %c0_0 = arith.constant 0 : index
    %0 = vector.load %arg1[%c0, %c0_0] : memref<8x256xf32, #tpu.memory_space<vmem>>, vector<8x256xf32>
    %cst = arith.constant dense<0.000000e+00> : vector<8xf32>
    %1 = vector.multi_reduction <add>, %0, %cst [1] : vector<8x256xf32> to vector<8xf32>
    %2 = vector.shape_cast %1 : vector<8xf32> to vector<8x1xf32>
    %cst_1 = arith.constant 2.560000e+02 : f32
    %3 = vector.broadcast %cst_1 : f32 to vector<8x1xf32>
    %4 = arith.divf %2, %3 : vector<8x1xf32>
    %5 = vector.broadcast %4 : vector<8x1xf32> to vector<8x256xf32>
    %6 = arith.subf %0, %5 : vector<8x256xf32>
    %7 = arith.mulf %6, %6 : vector<8x256xf32>
    %cst_2 = arith.constant dense<0.000000e+00> : vector<8xf32>
    %8 = vector.multi_reduction <add>, %7, %cst_2 [1] : vector<8x256xf32> to vector<8xf32>
    %9 = vector.shape_cast %8 : vector<8xf32> to vector<8x1xf32>
    %cst_3 = arith.constant 2.550000e+02 : f32
    %10 = vector.broadcast %cst_3 : f32 to vector<8x1xf32>
    %11 = arith.divf %9, %10 : vector<8x1xf32>
    %cst_4 = arith.constant 9.99999997E-7 : f32
    %12 = vector.broadcast %cst_4 : f32 to vector<8x1xf32>
    %13 = arith.addf %11, %12 : vector<8x1xf32>
    %14 = math.rsqrt %13 : vector<8x1xf32>
    %c0_5 = arith.constant 0 : index
    %c0_6 = arith.constant 0 : index
    %15 = vector.load %arg2[%c0_5, %c0_6] : memref<8x1xf32, #tpu.memory_space<vmem>>, vector<8x1xf32>
    %16 = arith.mulf %15, %14 : vector<8x1xf32>
    %c0_7 = arith.constant 0 : index
    %c0_8 = arith.constant 0 : index
    %17 = vector.load %arg3[%c0_7, %c0_8] : memref<8x1xf32, #tpu.memory_space<vmem>>, vector<8x1xf32>
    %18 = arith.mulf %4, %16 : vector<8x1xf32>
    %19 = arith.subf %17, %18 : vector<8x1xf32>
    %c0_9 = arith.constant 0 : index
    %c0_10 = arith.constant 0 : index
    %20 = vector.load %arg1[%c0_9, %c0_10] : memref<8x256xf32, #tpu.memory_space<vmem>>, vector<8x256xf32>
    %21 = vector.broadcast %16 : vector<8x1xf32> to vector<8x256xf32>
    %22 = arith.mulf %20, %21 : vector<8x256xf32>
    %23 = vector.broadcast %19 : vector<8x1xf32> to vector<8x256xf32>
    %24 = arith.addf %22, %23 : vector<8x256xf32>
    %c0_11 = arith.constant 0 : index
    %c0_12 = arith.constant 0 : index
    %25 = vector.load %arg4[%c0_11, %c0_12] : memref<8x256xf32, #tpu.memory_space<vmem>>, vector<8x256xf32>
    tpu.vector_store %arg4[%c0_11, %c0_12], %24 {strides = array<i32>} : memref<8x256xf32, #tpu.memory_space<vmem>>, vector<8x256xf32>,
    return
  }
  func.func @transform_0(%arg0: i32) -> (i32, i32) {
    %c0_i32 = arith.constant 0 : i32
    %c0_i32_0 = arith.constant 0 : i32
    return %arg0, %c0_i32 : i32, i32
  }
  func.func @transform_1(%arg0: i32) -> (i32, i32) {
    %c0_i32 = arith.constant 0 : i32
    %c0_i32_0 = arith.constant 0 : i32
    return %arg0, %c0_i32 : i32, i32
  }
  func.func @transform_2(%arg0: i32) -> (i32, i32) {
    %c0_i32 = arith.constant 0 : i32
    %c0_i32_0 = arith.constant 0 : i32
    return %arg0, %c0_i32 : i32, i32
  }
  func.func @transform_3(%arg0: i32) -> (i32, i32) {
    %c0_i32 = arith.constant 0 : i32
    %c0_i32_0 = arith.constant 0 : i32
    return %arg0, %c0_i32 : i32, i32
  }
}

</mosaic_0001>

<bundles_post_ra>
// kernel: tpu_custom_call.1
= control target key start
LH: loop header
LB: loop body
LE: loop exit
PB: predicated region body
PF: predicated region fallthrough
CT: control target
= control target key end

     0   :  { %s133_s0 = inlined_call_operand.vmem [shape: f32[8,256], index: 0, kind: input, shape index: {}]   ;;  %s134_s1 = inlined_call_operand.vmem [shape: f32[8,1], index: 1, kind: input, shape index: {}]   ;;  %s135_s2 = inlined_call_operand.vmem [shape: f32[8,1], index: 2, kind: input, shape index: {}]   ;;  %s136_s3 = inlined_call_operand.hbm [shape: f32[8,256], index: 3, kind: output, shape index: {}]  }
   0x1   :  { %v15_v0 = vld [vmem:[%s133_s0] sm:$0xff]  ;;  %v16_v1 = vld [vmem:[%s133_s0 + $0x8] sm:$0xff] }
   0x2   :  { %8 = vsyncpa [#allocation3], 0  ;;  %v17_v2 = vadd.f32 %v16_v1, %v15_v0  ;;  %v96_v10 = vmov 0   ;;  %v33_v14 = vld [vmem:[%s134_s1] sm:$0xff]  ;;  %s97_s19 = smov [#allocation2]  }
   0x3   :  { %70 = vset.pattern.permute.xlu1 %v96_v10  ;;  %71 = vset.pattern.permute.xlu0 %v96_v10  ;;  %v35_v17 = vld [vmem:[%s135_s2] sm:$0xff]  ;;  %s60_s20 = sshll.u32 %s97_s19, 4  ;;  %s61_s20 = int_to_ptr.vmem [resolvable:$true] %s60_s20 }
   0x4   :  { %18 = vadd.xlane.f32.xlu0 %v17_v2  ;;  %s74_s1 = scalar_lea.vmem %s61_s20, 256  ;;  %p79_p1 = scmp.lt.s32.totalorder %s61_s20, %s61_s20 }
   0x5   :  { %p75_p0 = scmp.ne.s32.totalorder %s61_s20, %s74_s1  ;;  %p80_p2 = scmp.lt.s32.totalorder %s74_s1, %s74_s1 }
   0x7   :  { %p81_p3 = por %p80_p2, %p79_p1 }
   0x9   :  { %p82_p4 = pnand %p81_p3, %p75_p0 }
  0x8d   :  { %v19_v3 = vpop.xlane.xlu0 %18 }
  0x8e   :  { %v21_v4 = vmul.f32 0.00390625, %v19_v3 }
  0x90   :  { %v22_v5 = vsub.f32 %v15_v0, %v21_v4  ;;  %v23_v6 = vsub.f32 %v16_v1, %v21_v4 }
  0x92   :  { %v24_v7 = vmul.f32 %v22_v5, %v22_v5  ;;  %v25_v8 = vmul.f32 %v23_v6, %v23_v6 }
  0x94   :  { %v26_v9 = vadd.f32 %v25_v8, %v24_v7 }
  0x96   :  { %27 = vadd.xlane.f32.xlu0 %v26_v9 }
 0x11f   :  { %v28_v11 = vpop.xlane.xlu0 %27 }
 0x120   :  { %v30_v12 = vmul.f32 0.003921569, %v28_v11 }
 0x122   :  { %v31_v13 = vadd.f32 1e-06, %v30_v12 }
 0x124   :  { %72 = vrsqrt.f32 %v31_v13 }
 0x131   :  { %v73_v15 = vpop.eup %72 }
 0x132   :  { %v34_v16 = vmul.f32 %v73_v15, %v33_v14 }
 0x134   :  { %40 = vperm.xlu1 %70, %v34_v16   ;;  %v36_v18 = vmul.f32 %v34_v16, %v21_v4 }
 0x136   :  { %v37_v19 = vsub.f32 %v35_v17, %v36_v18 }
 0x138   :  { %47 = vperm.xlu1 %70, %v37_v19  }
 0x1af   :  { %v41_v20 = vpop.permute.xlu1 %40 }
 0x1b0   :  { %v43_v21 = vmul.f32 %v41_v20, %v15_v0  ;;  %v44_v22 = vmul.f32 %v41_v20, %v16_v1 }
 0x1b3   :  { %v48_v23 = vpop.permute.xlu1 %47 }
 0x1b4   :  { %v50_v24 = vadd.f32 %v48_v23, %v43_v21  ;;  %v51_v25 = vadd.f32 %v48_v23, %v44_v22 }
 0x1b6   :  { %52 = vst [vmem:[#allocation2] sm:$0xff] %v50_v24  ;;  %53 = vst [vmem:[#allocation2 + $0x8] sm:$0xff] %v51_v25 }
 0x1b7   :  { %85 = shalt.err (!%p82_p4)
}
 0x1b8   :  { %63 = dma.vmem_to_hbm [thread:$0]  %s61_s20, 256, %s136_s3, [#allocation3]  }
 0x1b9   :  { %94 = dma.done.wait [#allocation3], 256  }
 0x1ba   :  { %95 = vsyncadd [#allocation3], 4294967040 }
 0x1bb   :  { %67 = vsyncpa [#allocation3], 1 }

</bundles_post_ra>
